<compile_context>
chip_gen: v7x
topology: tpu7x:2x2x1
jax: 0.10.0
libtpu: 0.0.40
codegen_flags: <defaults>
</compile_context>

<pallas_src>
import functools

import jax
import jax.numpy as jnp
from jax.experimental import pallas as pl
from jax.experimental.pallas import tpu as pltpu

_INV_SQRT2 = 0.7071067811865476


def _exact_gelu(x):
    # torch F.gelu default (approximate='none'); erf kept for strict parity.
    return 0.5 * x * (1.0 + jax.lax.erf(x * _INV_SQRT2))


def _round_up(n, m):
    return ((n + m - 1) // m) * m


def _pick_hw_tile(hw, target):
    """Largest divisor of hw that is <= target and a multiple of 8 (else hw)."""
    if hw <= target:
        return hw
    for t in range(target, 7, -1):
        if hw % t == 0 and t % 8 == 0:
            return t
    return hw


def _ff_kernel(x_ref, w1a1_ref, w1g1_ref, w1a2_ref, w1g2_ref, w2a_ref, w2b_ref,
               o_ref, *scratch, shift):
    # x_ref:   (1, 1, THW, C)        current (batch, frame, hw-tile) block
    # w1a1/w1g1: (C, half1)  w1a2/w1g2: (C, half2)   GEGLU weights, pre-split
    # w2a:     (half1, Cout_pad)  w2b: (half2, Cout_pad)  gamma*sqrt(inner) folded in
    # o_ref:   (1, 1, THW, Cout_pad)
    # scratch[0] (if shift): (THW, half2) carry of previous frame's 2nd chunk
    f = pl.program_id(2)
    x = x_ref[0, 0]                                             # (THW, C)

    # proj_in + GEGLU, computed per shift-chunk so no unaligned slice/concat.
    z1 = (jnp.dot(x, w1a1_ref[...], preferred_element_type=jnp.float32)
          * _exact_gelu(jnp.dot(x, w1g1_ref[...],
                                preferred_element_type=jnp.float32)))  # (THW, half1)
    z2 = (jnp.dot(x, w1a2_ref[...], preferred_element_type=jnp.float32)
          * _exact_gelu(jnp.dot(x, w1g2_ref[...],
                                preferred_element_type=jnp.float32)))  # (THW, half2)

    if shift:
        prev_ref = scratch[0]

        @pl.when(f == 0)
        def _():
            prev_ref[...] = jnp.zeros_like(prev_ref)

        z2_prev = prev_ref[...]        # previous frame's 2nd chunk (zeros @ f=0)
        prev_ref[...] = z2             # stash current frame's 2nd chunk
        z2 = z2_prev

    # RMSNorm: F.normalize == x / max(||x||, 1e-12) == x * rsqrt(max(||x||^2, 1e-24))
    ssq = (jnp.sum(z1 * z1, axis=-1, keepdims=True)
           + jnp.sum(z2 * z2, axis=-1, keepdims=True))          # (THW, 1)
    scale = jax.lax.rsqrt(jnp.maximum(ssq, 1e-24))

    # proj_out: gamma * sqrt(inner) already folded into w2a / w2b rows.
    out = jnp.dot(z1 * scale, w2a_ref[...], preferred_element_type=jnp.float32)
    out = out + jnp.dot(z2 * scale, w2b_ref[...],
                        preferred_element_type=jnp.float32)     # (THW, Cout_pad)
    o_ref[0, 0] = out.astype(o_ref.dtype)


def feedforward_pallas(x, w1, w2, gamma, enable_time=True, hw_tile_target=512):
    """x: (B, C, F, H, W) or (B, C, H, W) float32 (PyTorch NCDHW convention)."""
    is_video = x.ndim == 5
    if not is_video:
        x = x[:, :, None]                  # (B, C, 1, H, W)
    enable_time = bool(enable_time and is_video)

    B, C, F, H, W = x.shape
    inner2 = w1.shape[1]
    inner = inner2 // 2
    dim_out = w2.shape[1]
    HW = H * W
    half1 = (inner + 1) // 2               # torch.chunk(2): first chunk is ceil
    half2 = inner - half1
    shift = bool(enable_time and half2 > 0)

    THW = _pick_hw_tile(HW, hw_tile_target)
    n_hw = HW // THW

    # TODO(synk): these two full-tensor HBM transposes could be avoided if the
    # surrounding model kept activations channel-last.
    x_cl = jnp.transpose(x, (0, 2, 3, 4, 1)).reshape(B, F, HW, C).astype(jnp.float32)

    w1 = w1.astype(jnp.float32)
    w2 = w2.astype(jnp.float32)
    gamma = gamma.astype(jnp.float32)

    # GEGLU halves (a / gate), further split at the token-shift chunk boundary.
    w1a, w1g = w1[:, :inner], w1[:, inner:]
    w1a1, w1a2 = w1a[:, :half1], w1a[:, half1:]
    w1g1, w1g2 = w1g[:, :half1], w1g[:, half1:]

    # Fold RMSNorm's gamma * sqrt(inner) into proj_out weights; pad the output
    # channel dim to a multiple of 128 so stores are lane-dense.
    dim_out_p = _round_up(dim_out, 128)
    w2s = w2 * (gamma * jnp.sqrt(jnp.float32(inner)))[:, None]
    if dim_out_p != dim_out:
        w2s = jnp.pad(w2s, ((0, 0), (0, dim_out_p - dim_out)))
    w2a, w2b = w2s[:half1], w2s[half1:]

    kern = functools.partial(_ff_kernel, shift=shift)

    cost = pl.CostEstimate(
        flops=2 * B * F * HW * (C * inner2 + inner * dim_out),
        transcendentals=B * F * HW * (inner + 1),
        bytes_accessed=4 * (B * F * HW * (C + dim_out_p)
                            + C * inner2 + inner * dim_out_p),
    )

    scratch_shapes = [pltpu.VMEM((THW, half2), jnp.float32)] if shift else []

    out = pl.pallas_call(
        kern,
        out_shape=jax.ShapeDtypeStruct((B, F, HW, dim_out_p), jnp.float32),
        grid_spec=pltpu.PrefetchScalarGridSpec(
            num_scalar_prefetch=0,
            # F MUST be the innermost grid axis: the frame-shift carry in the
            # VMEM scratch relies on f running 0..F-1 sequentially per (b, hw).
            grid=(B, n_hw, F),
            in_specs=[
                pl.BlockSpec((1, 1, THW, C), lambda b, h, f: (b, f, h, 0)),
                pl.BlockSpec((C, half1), lambda b, h, f: (0, 0)),
                pl.BlockSpec((C, half1), lambda b, h, f: (0, 0)),
                pl.BlockSpec((C, half2), lambda b, h, f: (0, 0)),
                pl.BlockSpec((C, half2), lambda b, h, f: (0, 0)),
                pl.BlockSpec((half1, dim_out_p), lambda b, h, f: (0, 0)),
                pl.BlockSpec((half2, dim_out_p), lambda b, h, f: (0, 0)),
            ],
            out_specs=pl.BlockSpec((1, 1, THW, dim_out_p),
                                   lambda b, h, f: (b, f, h, 0)),
            scratch_shapes=scratch_shapes,
        ),
        compiler_params=pltpu.CompilerParams(
            # B and HW-tile axes are independent -> megacore-shardable (v7x);
            # frame axis must stay "arbitrary" for the carry.
            dimension_semantics=("parallel", "parallel", "arbitrary")),
        cost_estimate=cost,
    )(x_cl, w1a1, w1g1, w1a2, w1g2, w2a, w2b)

    if dim_out_p != dim_out:
        out = out[..., :dim_out]
    out = out.reshape(B, F, H, W, dim_out)
    out = jnp.transpose(out, (0, 4, 1, 2, 3)).astype(x.dtype)   # (B, dim, F, H, W)
    if not is_video:
        out = out[:, :, 0]
    return out


def feedforward_ref(x, w1, w2, gamma, enable_time=True):
    """Pure-JAX reference mirroring the PyTorch module (default precision)."""
    is_video = x.ndim == 5
    if not is_video:
        x = x[:, :, None]
    enable_time = bool(enable_time and is_video)
    inner = w1.shape[1] // 2
    F = x.shape[2]

    y = jnp.einsum('bcfhw,cd->bdfhw', x, w1)
    a, gate = y[:, :inner], y[:, inner:]
    z = a * _exact_gelu(gate)

    if enable_time:
        half1 = (inner + 1) // 2
        t, ts = z[:, :half1], z[:, half1:]
        ts = jnp.pad(ts, ((0, 0), (0, 0), (1, 0), (0, 0), (0, 0)))[:, :, :F]
        z = jnp.concatenate([t, ts], axis=1)

    l2 = jnp.sqrt(jnp.sum(z * z, axis=1, keepdims=True))
    normed = z / jnp.maximum(l2, 1e-12)
    normed = normed * jnp.sqrt(jnp.float32(inner)) * gamma.reshape(1, inner, 1, 1, 1)
    out = jnp.einsum('bcfhw,cd->bdfhw', normed, w2)
    if not is_video:
        out = out[:, :, 0]
    return out


if __name__ == "__main__":
    # Module config: FeedForward(dim=4, mult=4) -> inner_dim = int(4*4*2/3) = 10
    dim, mult = 4, 4
    inner = int(dim * mult * 2 / 3)

    B, F, H, W = 2, 4, 8, 8

    key = jax.random.PRNGKey(0)
    kx, kw1, kw2 = jax.random.split(key, 3)

    x = jax.random.normal(kx, (B, dim, F, H, W), dtype=jnp.float32)
    # Conv3d 1x1x1 weights (bias=False), stored as (C_in, C_out) matrices.
    w1 = jax.random.normal(kw1, (dim, inner * 2), dtype=jnp.float32) * 0.2
    w2 = jax.random.normal(kw2, (inner, dim), dtype=jnp.float32) * 0.2
    # RMSNorm gamma initialized to ones (as in the module).
    gamma = jnp.ones((inner,), dtype=jnp.float32)

    out = feedforward_pallas(x, w1, w2, gamma, enable_time=True)
    out = jax.block_until_ready(out)

    ref = feedforward_ref(x, w1, w2, gamma, enable_time=True)
    assert out.shape == (B, dim, F, H, W)
    max_err = float(jnp.max(jnp.abs(out - ref)))
    assert jnp.allclose(out, ref, rtol=2e-2, atol=2e-2), max_err

    print("KERNEL_OK")
</pallas_src>

<mosaic_0001>
module attributes {stable_mosaic.version = 11 : i64} {
  func.func @_ff_kernel(%arg0: i32, %arg1: i32, %arg2: i32, %arg3: memref<1x1x64x4xf32, #tpu.memory_space<vmem>>, %arg4: memref<4x5xf32, #tpu.memory_space<vmem>>, %arg5: memref<4x5xf32, #tpu.memory_space<vmem>>, %arg6: memref<4x5xf32, #tpu.memory_space<vmem>>, %arg7: memref<4x5xf32, #tpu.memory_space<vmem>>, %arg8: memref<5x128xf32, #tpu.memory_space<vmem>>, %arg9: memref<5x128xf32, #tpu.memory_space<vmem>>, %arg10: memref<1x1x64x128xf32, #tpu.memory_space<vmem>>, %arg11: memref<64x5xf32, #tpu.memory_space<vmem>>) attributes {dimension_semantics = [#tpu.dimension_semantics<parallel>, #tpu.dimension_semantics<parallel>, #tpu.dimension_semantics<arbitrary>], iteration_bounds = array<i64: 2, 1, 4>, scalar_prefetch = 0 : i64, scratch_operands = 1 : i64, tpu.core_type = #tpu.core_type<tc>, window_params = [{transform_indices = @transform_0, window_bounds = array<i64: 1, 1, 64, 4>}, {pipeline_mode = #tpu.pipeline_mode<synchronous>, transform_indices = @transform_1, window_bounds = array<i64: 4, 5>}, {pipeline_mode = #tpu.pipeline_mode<synchronous>, transform_indices = @transform_2, window_bounds = array<i64: 4, 5>}, {pipeline_mode = #tpu.pipeline_mode<synchronous>, transform_indices = @transform_3, window_bounds = array<i64: 4, 5>}, {pipeline_mode = #tpu.pipeline_mode<synchronous>, transform_indices = @transform_4, window_bounds = array<i64: 4, 5>}, {pipeline_mode = #tpu.pipeline_mode<synchronous>, transform_indices = @transform_5, window_bounds = array<i64: 5, 128>}, {pipeline_mode = #tpu.pipeline_mode<synchronous>, transform_indices = @transform_6, window_bounds = array<i64: 5, 128>}, {transform_indices = @transform_7, window_bounds = array<i64: 1, 1, 64, 128>}]} {
    %c0 = arith.constant 0 : index
    %c0_0 = arith.constant 0 : index
    %c0_1 = arith.constant 0 : index
    %c0_2 = arith.constant 0 : index
    %0 = vector.load %arg3[%c0, %c0_0, %c0_1, %c0_2] : memref<1x1x64x4xf32, #tpu.memory_space<vmem>>, vector<1x1x64x4xf32>
    %1 = vector.shape_cast %0 : vector<1x1x64x4xf32> to vector<64x4xf32>
    %c0_3 = arith.constant 0 : index
    %c0_4 = arith.constant 0 : index
    %2 = vector.load %arg4[%c0_3, %c0_4] : memref<4x5xf32, #tpu.memory_space<vmem>>, vector<4x5xf32>
    %cst = arith.constant dense<0.000000e+00> : vector<64x5xf32>
    %3 = tpu.matmul %1, %2, %cst {dimension_numbers = #tpu.dot_dimension_numbers<[1], [0], [0], [1], [0, 0, 1, 1], [], []>} : vector<64x4xf32>, vector<4x5xf32>, vector<64x5xf32> -> vector<64x5xf32>
    %c0_5 = arith.constant 0 : index
    %c0_6 = arith.constant 0 : index
    %4 = vector.load %arg5[%c0_5, %c0_6] : memref<4x5xf32, #tpu.memory_space<vmem>>, vector<4x5xf32>
    %cst_7 = arith.constant dense<0.000000e+00> : vector<64x5xf32>
    %5 = tpu.matmul %1, %4, %cst_7 {dimension_numbers = #tpu.dot_dimension_numbers<[1], [0], [0], [1], [0, 0, 1, 1], [], []>} : vector<64x4xf32>, vector<4x5xf32>, vector<64x5xf32> -> vector<64x5xf32>
    %cst_8 = arith.constant 5.000000e-01 : f32
    %6 = vector.broadcast %cst_8 : f32 to vector<64x5xf32>
    %7 = arith.mulf %6, %5 : vector<64x5xf32>
    %cst_9 = arith.constant 0.707106769 : f32
    %8 = vector.broadcast %cst_9 : f32 to vector<64x5xf32>
    %9 = arith.mulf %5, %8 : vector<64x5xf32>
    %10 = math.erf %9 : vector<64x5xf32>
    %cst_10 = arith.constant 1.000000e+00 : f32
    %11 = vector.broadcast %cst_10 : f32 to vector<64x5xf32>
    %12 = arith.addf %11, %10 : vector<64x5xf32>
    %13 = arith.mulf %7, %12 : vector<64x5xf32>
    %14 = arith.mulf %3, %13 : vector<64x5xf32>
    %c0_11 = arith.constant 0 : index
    %c0_12 = arith.constant 0 : index
    %15 = vector.load %arg6[%c0_11, %c0_12] : memref<4x5xf32, #tpu.memory_space<vmem>>, vector<4x5xf32>
    %cst_13 = arith.constant dense<0.000000e+00> : vector<64x5xf32>
    %16 = tpu.matmul %1, %15, %cst_13 {dimension_numbers = #tpu.dot_dimension_numbers<[1], [0], [0], [1], [0, 0, 1, 1], [], []>} : vector<64x4xf32>, vector<4x5xf32>, vector<64x5xf32> -> vector<64x5xf32>
    %c0_14 = arith.constant 0 : index
    %c0_15 = arith.constant 0 : index
    %17 = vector.load %arg7[%c0_14, %c0_15] : memref<4x5xf32, #tpu.memory_space<vmem>>, vector<4x5xf32>
    %cst_16 = arith.constant dense<0.000000e+00> : vector<64x5xf32>
    %18 = tpu.matmul %1, %17, %cst_16 {dimension_numbers = #tpu.dot_dimension_numbers<[1], [0], [0], [1], [0, 0, 1, 1], [], []>} : vector<64x4xf32>, vector<4x5xf32>, vector<64x5xf32> -> vector<64x5xf32>
    %cst_17 = arith.constant 5.000000e-01 : f32
    %19 = vector.broadcast %cst_17 : f32 to vector<64x5xf32>
    %20 = arith.mulf %19, %18 : vector<64x5xf32>
    %cst_18 = arith.constant 0.707106769 : f32
    %21 = vector.broadcast %cst_18 : f32 to vector<64x5xf32>
    %22 = arith.mulf %18, %21 : vector<64x5xf32>
    %23 = math.erf %22 : vector<64x5xf32>
    %cst_19 = arith.constant 1.000000e+00 : f32
    %24 = vector.broadcast %cst_19 : f32 to vector<64x5xf32>
    %25 = arith.addf %24, %23 : vector<64x5xf32>
    %26 = arith.mulf %20, %25 : vector<64x5xf32>
    %27 = arith.mulf %16, %26 : vector<64x5xf32>
    %c0_i32 = arith.constant 0 : i32
    %28 = arith.cmpi eq, %arg2, %c0_i32 : i32
    %29 = arith.extui %28 : i1 to i32
    %c0_i32_20 = arith.constant 0 : i32
    %30 = arith.cmpi ne, %29, %c0_i32_20 : i32
    scf.if %30 {
      %cst_38 = arith.constant 0.000000e+00 : f32
      %55 = vector.broadcast %cst_38 : f32 to vector<64x5xf32>
      %c0_39 = arith.constant 0 : index
      %c0_40 = arith.constant 0 : index
      %56 = vector.load %arg11[%c0_39, %c0_40] : memref<64x5xf32, #tpu.memory_space<vmem>>, vector<64x5xf32>
      tpu.vector_store %arg11[%c0_39, %c0_40], %55 {strides = array<i32>} : memref<64x5xf32, #tpu.memory_space<vmem>>, vector<64x5xf32>,
    } else {
    }
    %c0_21 = arith.constant 0 : index
    %c0_22 = arith.constant 0 : index
    %31 = vector.load %arg11[%c0_21, %c0_22] : memref<64x5xf32, #tpu.memory_space<vmem>>, vector<64x5xf32>
    %c0_23 = arith.constant 0 : index
    %c0_24 = arith.constant 0 : index
    %32 = vector.load %arg11[%c0_23, %c0_24] : memref<64x5xf32, #tpu.memory_space<vmem>>, vector<64x5xf32>
    tpu.vector_store %arg11[%c0_23, %c0_24], %27 {strides = array<i32>} : memref<64x5xf32, #tpu.memory_space<vmem>>, vector<64x5xf32>,
    %33 = arith.mulf %14, %14 : vector<64x5xf32>
    %cst_25 = arith.constant dense<0.000000e+00> : vector<64xf32>
    %34 = vector.multi_reduction <add>, %33, %cst_25 [1] : vector<64x5xf32> to vector<64xf32>
    %35 = vector.shape_cast %34 : vector<64xf32> to vector<64x1xf32>
    %36 = arith.mulf %31, %31 : vector<64x5xf32>
    %cst_26 = arith.constant dense<0.000000e+00> : vector<64xf32>
    %37 = vector.multi_reduction <add>, %36, %cst_26 [1] : vector<64x5xf32> to vector<64xf32>
    %38 = vector.shape_cast %37 : vector<64xf32> to vector<64x1xf32>
    %39 = arith.addf %35, %38 : vector<64x1xf32>
    %cst_27 = arith.constant 1.000000e-24 : f32
    %40 = vector.broadcast %cst_27 : f32 to vector<64x1xf32>
    %41 = arith.maximumf %39, %40 : vector<64x1xf32>
    %42 = math.rsqrt %41 : vector<64x1xf32>
    %43 = vector.broadcast %42 : vector<64x1xf32> to vector<64x5xf32>
    %44 = arith.mulf %14, %43 : vector<64x5xf32>
    %c0_28 = arith.constant 0 : index
    %c0_29 = arith.constant 0 : index
    %45 = vector.load %arg8[%c0_28, %c0_29] : memref<5x128xf32, #tpu.memory_space<vmem>>, vector<5x128xf32>
    %cst_30 = arith.constant dense<0.000000e+00> : vector<64x128xf32>
    %46 = tpu.matmul %44, %45, %cst_30 {dimension_numbers = #tpu.dot_dimension_numbers<[1], [0], [0], [1], [0, 0, 1, 1], [], []>} : vector<64x5xf32>, vector<5x128xf32>, vector<64x128xf32> -> vector<64x128xf32>
    %47 = vector.broadcast %42 : vector<64x1xf32> to vector<64x5xf32>
    %48 = arith.mulf %31, %47 : vector<64x5xf32>
    %c0_31 = arith.constant 0 : index
    %c0_32 = arith.constant 0 : index
    %49 = vector.load %arg9[%c0_31, %c0_32] : memref<5x128xf32, #tpu.memory_space<vmem>>, vector<5x128xf32>
    %cst_33 = arith.constant dense<0.000000e+00> : vector<64x128xf32>
    %50 = tpu.matmul %48, %49, %cst_33 {dimension_numbers = #tpu.dot_dimension_numbers<[1], [0], [0], [1], [0, 0, 1, 1], [], []>} : vector<64x5xf32>, vector<5x128xf32>, vector<64x128xf32> -> vector<64x128xf32>
    %51 = arith.addf %46, %50 : vector<64x128xf32>
    %c0_34 = arith.constant 0 : index
    %c0_35 = arith.constant 0 : index
    %c0_36 = arith.constant 0 : index
    %c0_37 = arith.constant 0 : index
    %52 = vector.load %arg10[%c0_34, %c0_35, %c0_36, %c0_37] : memref<1x1x64x128xf32, #tpu.memory_space<vmem>>, vector<1x1x64x128xf32>
    %53 = vector.shape_cast %52 : vector<1x1x64x128xf32> to vector<64x128xf32>
    %54 = vector.shape_cast %51 : vector<64x128xf32> to vector<1x1x64x128xf32>
    tpu.vector_store %arg10[%c0_34, %c0_35, %c0_36, %c0_37], %54 {strides = array<i32>} : memref<1x1x64x128xf32, #tpu.memory_space<vmem>>, vector<1x1x64x128xf32>,
    return
  }
  func.func @transform_0(%arg0: i32, %arg1: i32, %arg2: i32) -> (i32, i32, i32, i32) {
    %c0_i32 = arith.constant 0 : i32
    %c0_i32_0 = arith.constant 0 : i32
    return %arg0, %arg2, %arg1, %c0_i32 : i32, i32, i32, i32
  }
  func.func @transform_1(%arg0: i32, %arg1: i32, %arg2: i32) -> (i32, i32) {
    %c0_i32 = arith.constant 0 : i32
    %c0_i32_0 = arith.constant 0 : i32
    %c0_i32_1 = arith.constant 0 : i32
    return %c0_i32, %c0_i32_0 : i32, i32
  }
  func.func @transform_2(%arg0: i32, %arg1: i32, %arg2: i32) -> (i32, i32) {
    %c0_i32 = arith.constant 0 : i32
    %c0_i32_0 = arith.constant 0 : i32
    %c0_i32_1 = arith.constant 0 : i32
    return %c0_i32, %c0_i32_0 : i32, i32
  }
  func.func @transform_3(%arg0: i32, %arg1: i32, %arg2: i32) -> (i32, i32) {
    %c0_i32 = arith.constant 0 : i32
    %c0_i32_0 = arith.constant 0 : i32
    %c0_i32_1 = arith.constant 0 : i32
    return %c0_i32, %c0_i32_0 : i32, i32
  }
  func.func @transform_4(%arg0: i32, %arg1: i32, %arg2: i32) -> (i32, i32) {
    %c0_i32 = arith.constant 0 : i32
    %c0_i32_0 = arith.constant 0 : i32
    %c0_i32_1 = arith.constant 0 : i32
    return %c0_i32, %c0_i32_0 : i32, i32
  }
  func.func @transform_5(%arg0: i32, %arg1: i32, %arg2: i32) -> (i32, i32) {
    %c0_i32 = arith.constant 0 : i32
    %c0_i32_0 = arith.constant 0 : i32
    %c0_i32_1 = arith.constant 0 : i32
    return %c0_i32, %c0_i32_0 : i32, i32
  }
  func.func @transform_6(%arg0: i32, %arg1: i32, %arg2: i32) -> (i32, i32) {
    %c0_i32 = arith.constant 0 : i32
    %c0_i32_0 = arith.constant 0 : i32
    %c0_i32_1 = arith.constant 0 : i32
    return %c0_i32, %c0_i32_0 : i32, i32
  }
  func.func @transform_7(%arg0: i32, %arg1: i32, %arg2: i32) -> (i32, i32, i32, i32) {
    %c0_i32 = arith.constant 0 : i32
    %c0_i32_0 = arith.constant 0 : i32
    return %arg0, %arg2, %arg1, %c0_i32 : i32, i32, i32, i32
  }
}

</mosaic_0001>

<bundles_post_ra>
// kernel: tpu_custom_call.1
= control target key start
LH: loop header
LB: loop body
LE: loop exit
PB: predicated region body
PF: predicated region fallthrough
CT: control target
= control target key end

     0   :  { %s2278_s0 = inlined_call_operand.vmem [shape: f32[2,4,64,4], index: 0, kind: input, shape index: {}]   ;;  %s2279_s1 = inlined_call_operand.vmem [shape: f32[4,5], index: 1, kind: input, shape index: {}]   ;;  %s2280_s2 = inlined_call_operand.vmem [shape: f32[4,5], index: 2, kind: input, shape index: {}]   ;;  %s2281_s3 = inlined_call_operand.vmem [shape: f32[4,5], index: 3, kind: input, shape index: {}]   ;;  %s2282_s4 = inlined_call_operand.vmem [shape: f32[4,5], index: 4, kind: input, shape index: {}]   ;;  %s2283_s5 = inlined_call_operand.vmem [shape: f32[5,128], index: 5, kind: input, shape index: {}]   ;;  %s2284_s6 = inlined_call_operand.vmem [shape: f32[5,128], index: 6, kind: input, shape index: {}]   ;;  %s2285_s7 = inlined_call_operand.hbm [shape: f32[2,4,64,128], index: 7, kind: output, shape index: {}]  }
   0x1   :  { %2287 = sst [smem:[#allocation6_spill]] %s2279_s1 }
   0x2   :  { %2288 = sst [smem:[#allocation7_spill]] %s2280_s2 }
   0x3   :  { %12 = vsyncpa [#allocation4], 0 }
   0x4   :  { %14 = vsyncpa [#allocation4 + $0x1], 0  ;;  %s1895_s24 = smov 0   ;;  %s1897_s25 = smov 0  }
   0x5   :  { %s1899_s26 = smov 0   ;;  %s1901_s27 = smov 0  }
   0x6   :  { %s1903_s28 = smov 0   ;;  %s1905_s29 = smov 0  }
   0x7   :  { %s1907_s30 = smov 0   ;;  %s1909_s8 = smov 0  }
   0x8 LB: > { %s1417_s9 = sadd.s32 4294967295, %s1849_s8   ;;  %s1418_s10 = sadd.s32 4294967294, %s1849_s8   ;;  %s1849_s8 = sphi %s1909_s8, %s20_s8   ;;  %s1845_s30 = sphi %s1907_s30, %s2300_s30   ;;  %s1841_s29 = sphi %s1905_s29, %s2299_s29   ;;  %s1837_s28 = sphi %s1903_s28, %s2298_s28   ;;  %s1833_s27 = sphi %s1901_s27, %s2297_s27   ;;  %s1829_s26 = sphi %s1899_s26, %s2296_s26   ;;  %s1825_s25 = sphi %s1897_s25, %s2295_s25   ;;  %s1821_s24 = sphi %s1895_s24, %s2294_s24  }
   0x9   : > { %s32_s11 = sadd.s32 1, %s1841_s29  ;;  %s39_s12 = sadd.s32 1, %s1845_s30 }
   0xa   : > { %p33_p0 = scmp.ge.s32.totalorder %s32_s11, 4  ;;  %p216_p1 = scmp.ne.s32.totalorder %s1829_s26, %s1825_s25 }
   0xb   : > { %p217_p2 = scmp.eq.s32.totalorder %s1417_s9, 7  ;;  %p222_p5 = scmp.ne.s32.totalorder %s1825_s25, %s1821_s24 }
   0xc   : > { %s2302_s11 = smov (%p33_p0, %s32_s11), 0  ;;  %s2304_s12 = smov (!%p33_p0, %s39_s12), %s1845_s30 }
   0xd   : > { %s200_s13 = ssub.s32 %s1841_s29, %s2302_s11  ;;  %p1946_p3 = por %p217_p2, %p216_p1 }
   0xe   : > { %p41_p4 = scmp.ge.s32.totalorder %s2304_s12, 2  ;;  %p223_p6 = scmp.eq.s32.totalorder %s1418_s10, 7 }
   0xf   : > { %p1421_p7 = scmp.ge.s32.totalorder %s1849_s8, 1  ;;  %p276_p9 = scmp.lt.s32.totalorder %s1849_s8, 9 }
  0x10   : > { %s2306_s12 = smov (%p41_p4, %s2304_s12), 0  ;;  %p1955_p8 = por %p223_p6, %p222_p5 }
  0x11   : > { %s199_s16 = ssub.s32 %s1845_s30, %s2306_s12  ;;  %s206_s17 = sadd.s32 1, %s1829_s26 }
  0x12   : > { %s201_s18 = sor.u32 %s200_s13, %s199_s16  ;;  %p277_p10 = pnand %p1421_p7, %p276_p9 }
  0x13   : > { %p204_p11 = scmp.eq.s32.totalorder %s201_s18, 0  ;;  %s2286_s20 = sand.u32 (!%p277_p10), 1, %s1825_s25   ;;  %vm365_vm0 = vcmask (!%p277_p10), 1043456   ;;  %v631_v2 = vld [vmem:[%s2281_s3] sm:$0xf] (!%p277_p10)  ;;  %vm340_vm1 = vcmask (!%p277_p10), 31744  }
  0x14   : > { %280 = sbr.rel (%p277_p10) target bundleno = 746 (0x2ea), region = 48  ;;  %s2291_s1 = sld [smem:[#allocation6_spill]] (!%p277_p10)  ;;  %1569 = vmatprep.subr.msk.mxu0 (!%p277_p10), %vm365_vm0, %v631_v2  ;;  %v740_v6 = vld [vmem:[%s2282_s4] sm:$0xf] (!%p277_p10) }
  0x15   : > { %s1964_s19 = scalar_select %p204_p11, %s1829_s26, %s206_s17  }
  0x16   : > { %p317_p12 = scmp.lt.s32.totalorder (!%p277_p10), %s1837_s28, 1  ;;  %s1973_s23 = sshll.u32 (!%p277_p10), %s2286_s20, 6  ;;  %1570 = vmatpush3.msk.msra.mxu0 (!%p277_p10), %vm365_vm0, %v631_v2 }
  0x17   : > { %p319_p13 = scmp.lt.s32.totalorder (!%p277_p10), %s1833_s27, 3  ;;  %s2292_s2 = sld [smem:[#allocation7_spill]] (!%p277_p10) }
  0x18   : > { %p1462_p0 = scmp.ne.s32.totalorder (!%p277_p10), %s1833_s27, 0 }
  0x1a   : > { %v339_v0 = vld [vmem:[%s2291_s1] sm:$0xf] (!%p277_p10) }
  0x1b   : > { %1541 = vmatprep.subr.msk.mxu1 %vm365_vm0, %v339_v0  ;;  %s318_s17 = scalar_select %p317_p12, %s1837_s28, 1 }
  0x1c   : > { %1542 = vmatpush3.msk.msra.mxu1 %vm365_vm0, %v339_v0  ;;  %s320_s18 = scalar_select %p319_p13, %s1833_s27, 3 }
  0x1d   : > { %v474_v1 = vld [vmem:[%s2292_s2] sm:$0xf]  ;;  %s1424_s21 = sshll.u32 %s318_s17, 5  ;;  %vm901_vm2 = vcmask (!%p1462_p0), 39936  }
  0x1e   : > { %1555 = vmatprep.subr.msk.mxu1 %vm365_vm0, %v474_v1  ;;  %s1423_s22 = sshll.u32 %s320_s18, 3 }
  0x1f   : > { %s326_s20 = sadd.s32 %s1424_s21, %s1423_s22 }
  0x20   : > { %s1425_s1 = sshll.u32 %s326_s20, 3 }
  0x21   : > { %s328_s2 = scalar_lea.vmem %s2278_s0, %s1425_s1  ;;  %s2089_s1 = scalar_lea.vmem [#allocation3], %s1973_s23 }
  0x22   : > { %v331_v3 = vld [vmem:[%s328_s2] sm:$0xff]  ;;  %v332_v4 = vld [vmem:[%s328_s2 + $0x8] sm:$0xff]  ;;  %v333_v5 = vld [vmem:[%s328_s2 + $0x10] sm:$0xff] }
  0x23   : > { %1543 = vmatprep.mubr.msk.f32.mxu1 %vm340_vm1, %v331_v3  ;;  %1571 = vmatprep.mubr.msk.f32.mxu0 %vm340_vm1, %v331_v3  ;;  %v334_v7 = vld [vmem:[%s328_s2 + $0x18] sm:$0xff]  ;;  %v335_v8 = vld [vmem:[%s328_s2 + $0x20] sm:$0xff]  ;;  %v336_v9 = vld [vmem:[%s328_s2 + $0x28] sm:$0xff] }
  0x24   : > { %1544 = vmatmul.mubr.msk.f32.vlgmr.msra.gmra.mrb[0].mxu1 %vm340_vm1, %v332_v4  ;;  %1572 = vmatmul.mubr.msk.f32.vlgmr.msra.gmra.mrb[0].mxu0 %vm340_vm1, %v332_v4  ;;  %v337_v10 = vld [vmem:[%s328_s2 + $0x30] sm:$0xff]  ;;  %v338_v11 = vld [vmem:[%s328_s2 + $0x38] sm:$0xff] }
  0x25   : > { %1556 = vmatpush3.msk.msra.mxu1 %vm365_vm0, %v474_v1  ;;  %1546 = vmatprep.mubr.msk.f32.mxu1 %vm340_vm1, %v333_v5 }
  0x26   : > { %1583 = vmatprep.subr.msk.mxu1 %vm365_vm0, %v740_v6  ;;  %1574 = vmatprep.mubr.msk.f32.mxu0 %vm340_vm1, %v333_v5 }
  0x28   : > { %1547 = vmatmul.mubr.msk.f32.gmra.mrb[2].mxu1 %vm340_vm1, %v334_v7  ;;  %1575 = vmatmul.mubr.msk.f32.gmra.mrb[2].mxu0 %vm340_vm1, %v334_v7 }
  0x29   : > { %1549 = vmatprep.mubr.msk.f32.mxu1 %vm340_vm1, %v335_v8  ;;  %1577 = vmatprep.mubr.msk.f32.mxu0 %vm340_vm1, %v335_v8 }
  0x2c   : > { %1550 = vmatmul.mubr.msk.f32.gmra.mrb[4].mxu1 %vm340_vm1, %v336_v9  ;;  %1578 = vmatmul.mubr.msk.f32.gmra.mrb[4].mxu0 %vm340_vm1, %v336_v9 }
  0x2d   : > { %1552 = vmatprep.mubr.msk.f32.mxu1 %vm340_vm1, %v337_v10  ;;  %1580 = vmatprep.mubr.msk.f32.mxu0 %vm340_vm1, %v337_v10 }
  0x30   : > { %1553 = vmatmul.mubr.msk.f32.gmra.mrb[6].mxu1 %vm340_vm1, %v338_v11  ;;  %1581 = vmatmul.mubr.msk.f32.gmra.mrb[6].mxu0 %vm340_vm1, %v338_v11 }
  0x31   : > { %1557 = vmatprep.mubr.msk.f32.mxu1 %vm340_vm1, %v331_v3 }
  0x34   : > { %1558 = vmatmul.mubr.msk.f32.vlgmr.msra.gmra.mrb[8].mxu1 %vm340_vm1, %v332_v4 }
  0x35   : > { %1584 = vmatpush3.msk.msra.mxu1 %vm365_vm0, %v740_v6  ;;  %1560 = vmatprep.mubr.msk.f32.mxu1 %vm340_vm1, %v333_v5 }
  0x38   : > { %1561 = vmatmul.mubr.msk.f32.gmra.mrb[10].mxu1 %vm340_vm1, %v334_v7 }
  0x39   : > { %1563 = vmatprep.mubr.msk.f32.mxu1 %vm340_vm1, %v335_v8 }
  0x3c   : > { %1564 = vmatmul.mubr.msk.f32.gmra.mrb[12].mxu1 %vm340_vm1, %v336_v9 }
  0x3d   : > { %1566 = vmatprep.mubr.msk.f32.mxu1 %vm340_vm1, %v337_v10 }
  0x40   : > { %1567 = vmatmul.mubr.msk.f32.gmra.mrb[14].mxu1 %vm340_vm1, %v338_v11 }
  0x41   : > { %1585 = vmatprep.mubr.msk.f32.mxu1 %vm340_vm1, %v331_v3 }
  0x44   : > { %1586 = vmatmul.mubr.msk.f32.vlgmr.msra.gmra.mrb[16].mxu1 %vm340_vm1, %v332_v4 }
  0x45   : > { %1588 = vmatprep.mubr.msk.f32.mxu1 %vm340_vm1, %v333_v5 }
  0x48   : > { %1589 = vmatmul.mubr.msk.f32.gmra.mrb[18].mxu1 %vm340_vm1, %v334_v7 }
  0x49   : > { %1591 = vmatprep.mubr.msk.f32.mxu1 %vm340_vm1, %v335_v8 }
  0x4c   : > { %1592 = vmatmul.mubr.msk.f32.gmra.mrb[20].mxu1 %vm340_vm1, %v336_v9 }
  0x4d   : > { %1594 = vmatprep.mubr.msk.f32.mxu1 %vm340_vm1, %v337_v10 }
  0x50   : > { %1595 = vmatmul.mubr.msk.f32.gmra.mrb[22].mxu1 %vm340_vm1, %v338_v11 }
  0xf7   : > { %v1545_v12 = vpop.f32.mrb[0].mxu1  ;;  %v2030_v13 = vpop.f32.mrb[0].mxu0 }
  0xf8   : > { %v435_v14 = vpop.f32.mrb[1].mxu1  ;;  %v2032_v15 = vpop.f32.mrb[1].mxu0 }
  0xfb   : > { %v2034_v16 = vpop.f32.mrb[2].mxu1  ;;  %v2036_v17 = vpop.f32.mrb[2].mxu0 }
  0xfc   : > { %v2038_v18 = vpop.f32.mrb[3].mxu1  ;;  %v2040_v19 = vpop.f32.mrb[3].mxu0 }
  0xff   : > { %v2042_v20 = vpop.f32.mrb[4].mxu1  ;;  %v2044_v21 = vpop.f32.mrb[4].mxu0 }
 0x100   : > { %v2046_v22 = vpop.f32.mrb[5].mxu1  ;;  %v2048_v23 = vpop.f32.mrb[5].mxu0 }
 0x103   : > { %v2050_v24 = vpop.f32.mrb[6].mxu1  ;;  %v2052_v25 = vpop.f32.mrb[6].mxu0 }
 0x104   : > { %v2054_v26 = vpop.f32.mrb[7].mxu1  ;;  %v2056_v27 = vpop.f32.mrb[7].mxu0 }
 0x107   : > { %v1559_v28 = vpop.f32.mrb[8].mxu1 }
 0x108   : > { %v592_v29 = vmul.f32 0.70710677, %v1559_v28  ;;  %v544_v30 = vpop.f32.mrb[9].mxu1  ;;  %v584_v45 = vmul.f32 0.5, %v1559_v28 }
 0x109   : > { %v591_v31 = vmul.f32 0.70710677, %v544_v30  ;;  %v583_v48 = vmul.f32 0.5, %v544_v30 }
 0x10a   : > { %1707 = verf.f32 %v592_v29 }
 0x10b   : > { %1709 = verf.f32 %v591_v31  ;;  %v1562_v32 = vpop.f32.mrb[10].mxu1 }
 0x10c   : > { %v594_v33 = vmul.f32 0.70710677, %v1562_v32  ;;  %v554_v34 = vpop.f32.mrb[11].mxu1  ;;  %v586_v58 = vmul.f32 0.5, %v1562_v32 }
 0x10d   : > { %v593_v35 = vmul.f32 0.70710677, %v554_v34  ;;  %v585_v62 = vmul.f32 0.5, %v554_v34 }
 0x10e   : > { %1711 = verf.f32 %v594_v33 }
 0x10f   : > { %1713 = verf.f32 %v593_v35  ;;  %v1565_v36 = vpop.f32.mrb[12].mxu1 }
 0x110   : > { %v596_v37 = vmul.f32 0.70710677, %v1565_v36  ;;  %v564_v38 = vpop.f32.mrb[13].mxu1  ;;  %v588_v8 = vmul.f32 0.5, %v1565_v36 }
 0x111   : > { %v595_v39 = vmul.f32 0.70710677, %v564_v38 }
 0x112   : > { %1715 = verf.f32 %v596_v37 }
 0x113   : > { %1717 = verf.f32 %v595_v39  ;;  %v1568_v40 = vpop.f32.mrb[14].mxu1 }
 0x114   : > { %v1708_v41 = vpop.eup %1707  ;;  %v598_v42 = vmul.f32 0.70710677, %v1568_v40  ;;  %v574_v43 = vpop.f32.mrb[15].mxu1  ;;  %v590_v35 = vmul.f32 0.5, %v1568_v40 }
 0x115   : > { %v1710_v44 = vpop.eup %1709  ;;  %v608_v46 = vadd.f32 1.0, %v1708_v41  ;;  %v597_v47 = vmul.f32 0.70710677, %v574_v43 }
 0x116   : > { %v607_v49 = vadd.f32 1.0, %v1710_v44  ;;  %1719 = verf.f32 %v598_v42 }
 0x117   : > { %v616_v50 = vmul.f32 %v608_v46, %v584_v45  ;;  %1721 = verf.f32 %v597_v47  ;;  %v1587_v51 = vpop.f32.mrb[16].mxu1 }
 0x118   : > { %v1712_v52 = vpop.eup %1711  ;;  %v615_v53 = vmul.f32 %v607_v49, %v583_v48  ;;  %v858_v54 = vmul.f32 0.70710677, %v1587_v51  ;;  %v810_v55 = vpop.f32.mrb[17].mxu1  ;;  %v850_v40 = vmul.f32 0.5, %v1587_v51 }
 0x119   : > { %v1714_v56 = vpop.eup %1713  ;;  %v2058_v57 = vmul.f32 %v1545_v12, %v616_v50  ;;  %v610_v59 = vadd.f32 1.0, %v1712_v52  ;;  %v857_v60 = vmul.f32 0.70710677, %v810_v55  ;;  %v587_v12 = vmul.f32 0.5, %v564_v38 }
 0x11a   : > { %v2060_v61 = vmul.f32 %v615_v53, %v435_v14  ;;  %v609_v63 = vadd.f32 1.0, %v1714_v56  ;;  %1723 = verf.f32 %v858_v54  ;;  %v589_v38 = vmul.f32 0.5, %v574_v43 }
 0x11b   : > { %v618_v0 = vmul.f32 %v610_v59, %v586_v58  ;;  %1725 = verf.f32 %v857_v60  ;;  %v1590_v1 = vpop.f32.mrb[18].mxu1  ;;  %v849_v43 = vmul.f32 0.5, %v810_v55 }
 0x11c   : > { %v1716_v2 = vpop.eup %1715  ;;  %v617_v3 = vmul.f32 %v609_v63, %v585_v62  ;;  %v860_v4 = vmul.f32 0.70710677, %v1590_v1  ;;  %v820_v5 = vpop.f32.mrb[19].mxu1  ;;  %v852_v59 = vmul.f32 0.5, %v1590_v1 }
 0x11d   : > { %v1718_v6 = vpop.eup %1717  ;;  %v2063_v7 = vmul.f32 %v2034_v16, %v618_v0  ;;  %v612_v9 = vadd.f32 1.0, %v1716_v2  ;;  %v859_v10 = vmul.f32 0.70710677, %v820_v5 }
 0x11e   : > { %v2066_v11 = vmul.f32 %v617_v3, %v2038_v18  ;;  %v611_v14 = vadd.f32 1.0, %v1718_v6  ;;  %1727 = verf.f32 %v860_v4 }
 0x11f   : > { %v620_v28 = vmul.f32 %v612_v9, %v588_v8  ;;  %1729 = verf.f32 %v859_v10  ;;  %v1593_v29 = vpop.f32.mrb[20].mxu1 }
 0x120   : > { %v1720_v30 = vpop.eup %1719  ;;  %v619_v31 = vmul.f32 %v611_v14, %v587_v12  ;;  %v862_v32 = vmul.f32 0.70710677, %v1593_v29  ;;  %v830_v33 = vpop.f32.mrb[21].mxu1  ;;  %v854_v55 = vmul.f32 0.5, %v1593_v29 }
 0x121   : > { %v1722_v34 = vpop.eup %1721  ;;  %v2069_v16 = vmul.f32 %v2042_v20, %v620_v28  ;;  %v614_v36 = vadd.f32 1.0, %v1720_v30  ;;  %v861_v37 = vmul.f32 0.70710677, %v830_v33  ;;  %v853_v8 = vmul.f32 0.5, %v830_v33 }
 0x122   : > { %v2072_v18 = vmul.f32 %v619_v31, %v2046_v22  ;;  %v613_v39 = vadd.f32 1.0, %v1722_v34  ;;  %1731 = verf.f32 %v862_v32  ;;  %v1851_v34 = vmov (!%p1462_p0), 0.0  }
 0x123   : > { %v622_v41 = vmul.f32 %v614_v36, %v590_v35  ;;  %1733 = verf.f32 %v861_v37  ;;  %v1596_v42 = vpop.f32.mrb[22].mxu1  ;;  %902 = vst.msk [vmem:[#allocation2] sm:$0xff] (!%p1462_p0), %vm901_vm2, %v1851_v34  ;;  %903 = vst.msk [vmem:[#allocation2 + $0x8] sm:$0xff] (!%p1462_p0), %vm901_vm2, %v1851_v34 }
 0x124   : > { %v1724_v44 = vpop.eup %1723  ;;  %v621_v45 = vmul.f32 %v613_v39, %v589_v38  ;;  %v864_v46 = vmul.f32 0.70710677, %v1596_v42  ;;  %v840_v47 = vpop.f32.mrb[23].mxu1  ;;  %v856_v14 = vmul.f32 0.5, %v1596_v42  ;;  %904 = vst.msk [vmem:[#allocation2 + $0x10] sm:$0xff] (!%p1462_p0), %vm901_vm2, %v1851_v34  ;;  %905 = vst.msk [vmem:[#allocation2 + $0x18] sm:$0xff] (!%p1462_p0), %vm901_vm2, %v1851_v34 }
 0x125   : > { %v1726_v48 = vpop.eup %1725  ;;  %v2075_v20 = vmul.f32 %v2050_v24, %v622_v41  ;;  %v863_v49 = vmul.f32 0.70710677, %v840_v47  ;;  %v874_v50 = vadd.f32 1.0, %v1724_v44  ;;  %v851_v24 = vmul.f32 0.5, %v820_v5  ;;  %906 = vst.msk [vmem:[#allocation2 + $0x20] sm:$0xff] (!%p1462_p0), %vm901_vm2, %v1851_v34  ;;  %907 = vst.msk [vmem:[#allocation2 + $0x28] sm:$0xff] (!%p1462_p0), %vm901_vm2, %v1851_v34 }
 0x126   : > { %v2078_v22 = vmul.f32 %v621_v45, %v2054_v26  ;;  %1735 = verf.f32 %v864_v46  ;;  %v873_v52 = vadd.f32 1.0, %v1726_v48  ;;  %v855_v30 = vmul.f32 0.5, %v840_v47  ;;  %908 = vst.msk [vmem:[#allocation2 + $0x30] sm:$0xff] (!%p1462_p0), %vm901_vm2, %v1851_v34  ;;  %909 = vst.msk [vmem:[#allocation2 + $0x38] sm:$0xff] (!%p1462_p0), %vm901_vm2, %v1851_v34 }
 0x127   : > { %1737 = verf.f32 %v863_v49  ;;  %v882_v53 = vmul.f32 %v874_v50, %v850_v40 }
 0x128   : > { %v1728_v54 = vpop.eup %1727  ;;  %v881_v56 = vmul.f32 %v873_v52, %v849_v43 }
 0x129   : > { %v1730_v58 = vpop.eup %1729  ;;  %v890_v60 = vmul.f32 %v2030_v13, %v882_v53  ;;  %v876_v62 = vadd.f32 1.0, %v1728_v54 }
 0x12a   : > { %v889_v51 = vmul.f32 %v881_v56, %v2032_v15  ;;  %v875_v63 = vadd.f32 1.0, %v1730_v58 }
 0x12b   : > { %v884_v0 = vmul.f32 %v876_v62, %v852_v59 }
 0x12c   : > { %v1732_v2 = vpop.eup %1731  ;;  %v883_v26 = vmul.f32 %v875_v63, %v851_v24 }
 0x12d   : > { %v1734_v3 = vpop.eup %1733  ;;  %v892_v4 = vmul.f32 %v2036_v17, %v884_v0  ;;  %v878_v6 = vadd.f32 1.0, %v1732_v2 }
 0x12e   : > { %v891_v9 = vmul.f32 %v883_v26, %v2040_v19  ;;  %v877_v1 = vadd.f32 1.0, %v1734_v3 }
 0x12f   : > { %v886_v10 = vmul.f32 %v878_v6, %v854_v55 }
 0x130   : > { %v1736_v13 = vpop.eup %1735  ;;  %v885_v12 = vmul.f32 %v877_v1, %v853_v8  ;;  %900 = sbr.rel (%p1462_p0) target bundleno = 311 (0x137), region = 52 }
 0x131   : > { %v1738_v5 = vpop.eup %1737  ;;  %v894_v15 = vmul.f32 %v2044_v21, %v886_v10  ;;  %v880_v28 = vadd.f32 1.0, %v1736_v13 }
 0x132   : > { %v879_v31 = vadd.f32 1.0, %v1738_v5  ;;  %v893_v29 = vmul.f32 %v885_v12, %v2048_v23 }
 0x133   : > { %v888_v32 = vmul.f32 %v880_v28, %v856_v14 }
 0x134   : > { %v887_v17 = vmul.f32 %v879_v31, %v855_v30 }
 0x135   : > { %v896_v33 = vmul.f32 %v2052_v25, %v888_v32 }
 0x136   : > { %v895_v19 = vmul.f32 %v887_v17, %v2056_v27 }
 0x137 PF: > { %vm918_vm3 = vcmask 39936   ;;  %v928_v21 = vmul.f32 %v2058_v57, %v2058_v57  ;;  %v927_v23 = vmul.f32 %v2060_v61, %v2060_v61  ;;  %v2096_v25 = vld [vmem:[#allocation2 + $0x8] sm:$0xff]  ;;  %v2098_v27 = vld [vmem:[#allocation2] sm:$0xff]  ;;  %v2100_v35 = vld [vmem:[#allocation2 + $0x10] sm:$0xff]  ;;  %v929_v49 = vmul.f32 %v2066_v11, %v2066_v11  ;;  %s1482_s18 = sshll.u32 %s1833_s27, 3  ;;  %s1483_s21 = sshll.u32 %s1837_s28, 5 }
 0x138   : > { %v960_v36 = vmul.f32 %v2096_v25, %v2096_v25  ;;  %920 = vst.msk [vmem:[#allocation2 + $0x8] sm:$0xff] %vm918_vm3, %v890_v60  ;;  %v959_v37 = vmul.f32 %v2098_v27, %v2098_v27  ;;  %919 = vst.msk [vmem:[#allocation2] sm:$0xff] %vm918_vm3, %v889_v51  ;;  %v2109_v38 = vld [vmem:[#allocation2 + $0x18] sm:$0xff]  ;;  %v2111_v39 = vld [vmem:[#allocation2 + $0x20] sm:$0xff]  ;;  %v961_v40 = vmul.f32 %v2100_v35, %v2100_v35  ;;  %vm1057_vm4 = vcmask 1044480   ;;  %s1321_s22 = sadd.s32 %s1483_s21, %s1482_s18  ;;  %s1324_s10 = sshll.u32 %s2089_s1, 4  ;;  %s2220_s10 = int_to_ptr.vmem [resolvable:$true] %s1324_s10 }
 0x139   : > { %921 = vst.msk [vmem:[#allocation2 + $0x10] sm:$0xff] %vm918_vm3, %v891_v9  ;;  %v2113_v41 = vld [vmem:[#allocation2 + $0x28] sm:$0xff]  ;;  %v938_v42 = vsel %vm918_vm3, %v928_v21, 0.0  ;;  %v935_v44 = vsel %vm918_vm3, %v927_v23, 0.0  ;;  %922 = vst.msk [vmem:[#allocation2 + $0x18] sm:$0xff] %vm918_vm3, %v892_v4  ;;  %v2120_v45 = vld [vmem:[#allocation2 + $0x30] sm:$0xff]  ;;  %v962_v52 = vmul.f32 %v2109_v38, %v2109_v38  ;;  %v930_v53 = vmul.f32 %v2063_v7, %v2063_v7 }
 0x13a   : > { %923 = vst.msk [vmem:[#allocation2 + $0x20] sm:$0xff] %vm918_vm3, %v893_v29  ;;  %924 = vst.msk [vmem:[#allocation2 + $0x28] sm:$0xff] %vm918_vm3, %v894_v15  ;;  %v2122_v46 = vld [vmem:[#allocation2 + $0x38] sm:$0xff]  ;;  %939 = vadd.xlane.f32.xlu1 %v938_v42  ;;  %936 = vadd.xlane.f32.xlu0 %v935_v44  ;;  %v970_v47 = vsel %vm918_vm3, %v960_v36, 0.0  ;;  %v967_v48 = vsel %vm918_vm3, %v959_v37, 0.0  ;;  %v973_v50 = vsel %vm918_vm3, %v961_v40, 0.0  ;;  %v963_v58 = vmul.f32 %v2111_v39, %v2111_v39 }
 0x13b   : > { %925 = vst.msk [vmem:[#allocation2 + $0x30] sm:$0xff] %vm918_vm3, %v895_v19  ;;  %926 = vst.msk [vmem:[#allocation2 + $0x38] sm:$0xff] %vm918_vm3, %v896_v33  ;;  %v941_v43 = vsel %vm918_vm3, %v929_v49, 0.0  ;;  %v976_v54 = vsel %vm918_vm3, %v962_v52, 0.0  ;;  %v944_v56 = vsel %vm918_vm3, %v930_v53, 0.0  ;;  %v931_v59 = vmul.f32 %v2072_v18, %v2072_v18  ;;  %s1484_s9 = sshll.u32 %s1321_s22, 7 }
 0x13c   : > { %v979_v60 = vsel %vm918_vm3, %v963_v58, 0.0  ;;  %v964_v24 = vmul.f32 %v2113_v41, %v2113_v41  ;;  %v932_v51 = vmul.f32 %v2069_v16, %v2069_v16  ;;  %v965_v2 = vmul.f32 %v2120_v45, %v2120_v45  ;;  %v1032_v1 = vld [vmem:[%s2284_s6] sm:$0x1f]  ;;  %s2218_s27 = scalar_lea.hbm %s2285_s7, %s1484_s9  ;;  %s2293_s28 = sand.u32 1, %s1825_s25  }
 0x13d   : > { %v947_v62 = vsel %vm918_vm3, %v931_v59, 0.0  ;;  %v933_v26 = vmul.f32 %v2078_v22, %v2078_v22  ;;  %v966_v4 = vmul.f32 %v2122_v46, %v2122_v46  ;;  %v934_v6 = vmul.f32 %v2075_v20, %v2075_v20  ;;  %1597 = vmatprep.subr.msk.mxu0 %vm1057_vm4, %v1032_v1  ;;  %v1023_v10 = vld [vmem:[%s2283_s5] sm:$0x1f]  ;;  %s2226_s2 = scalar_lea.sflag [#allocation4], %s2293_s28  ;;  %s1755_s20 = scalar_lea.vmem %s2220_s10, 1024 }
 0x13e   : > { %971 = vadd.xlane.f32.xlu1 %v970_v47  ;;  %968 = vadd.xlane.f32.xlu0 %v967_v48  ;;  %v982_v63 = vsel %vm918_vm3, %v964_v24, 0.0  ;;  %v950_v0 = vsel %vm918_vm3, %v932_v51, 0.0  ;;  %v985_v3 = vsel %vm918_vm3, %v965_v2, 0.0  ;;  %p1756_p1 = scmp.ne.s32.totalorder %s2220_s10, %s1755_s20  ;;  %s1852_s23 = smov [#allocation3]  }
 0x13f   : > { %v953_v55 = vsel %vm918_vm3, %v933_v26, 0.0  ;;  %v988_v8 = vsel %vm918_vm3, %v966_v4, 0.0  ;;  %v956_v9 = vsel %vm918_vm3, %v934_v6, 0.0  ;;  %1598 = vmatpush3.msk.msra.mxu0 %vm1057_vm4, %v1032_v1  ;;  %s1759_s17 = sshll.u32 %s1852_s23, 4  ;;  %s1760_s17 = int_to_ptr.vmem [resolvable:$false] %s1759_s17 }
 0x140   : > { %1611 = vmatprep.subr.msk.mxu0 %vm1057_vm4, %v1023_v10  ;;  %p1757_p2 = pnand %p1756_p1, %p1946_p3  ;;  %s1761_s18 = scalar_lea.vmem %s1760_s17, 2048 }
 0x141   : > { %p1762_p5 = scmp.lt.s32.totalorder %s2220_s10, %s1760_s17  ;;  %p1763_p6 = scmp.lt.s32.totalorder %s1761_s18, %s1755_s20 }
 0x142   : > { %974 = vadd.xlane.f32.xlu1 %v973_v50  ;;  %942 = vadd.xlane.f32.xlu0 %v941_v43  ;;  %p1758_p4 = pneg %p1757_p2 }
 0x143   : > { %p1764_p7 = por %p1763_p6, %p1762_p5 }
 0x145   : > { %p1765_p9 = pnand %p1764_p7, %p1758_p4 }
 0x146   : > { %977 = vadd.xlane.f32.xlu1 %v976_v54  ;;  %945 = vadd.xlane.f32.xlu0 %v944_v56 }
 0x14a   : > { %980 = vadd.xlane.f32.xlu1 %v979_v60  ;;  %948 = vadd.xlane.f32.xlu0 %v947_v62 }
 0x14e   : > { %983 = vadd.xlane.f32.xlu1 %v982_v63  ;;  %951 = vadd.xlane.f32.xlu0 %v950_v0 }
 0x152   : > { %986 = vadd.xlane.f32.xlu1 %v985_v3  ;;  %954 = vadd.xlane.f32.xlu0 %v953_v55 }
 0x156   : > { %989 = vadd.xlane.f32.xlu1 %v988_v8  ;;  %957 = vadd.xlane.f32.xlu0 %v956_v9 }
 0x1c7   : > { %v940_v13 = vpop.xlane.xlu1 %939  ;;  %v937_v12 = vpop.xlane.xlu0 %936 }
 0x1cb   : > { %v972_v5 = vpop.xlane.xlu1 %971  ;;  %v969_v14 = vpop.xlane.xlu0 %968 }
 0x1cc   : > { %v992_v15 = vadd.f32 %v972_v5, %v940_v13  ;;  %v991_v28 = vadd.f32 %v969_v14, %v937_v12 }
 0x1ce   : > { %v1000_v30 = vmax.f32 %v992_v15, 1e-24  ;;  %v999_v31 = vmax.f32 %v991_v28, 1e-24 }
 0x1cf   : > { %v975_v29 = vpop.xlane.xlu1 %974  ;;  %v943_v32 = vpop.xlane.xlu0 %942 }
 0x1d0   : > { %1739 = vrsqrt.f32 %v1000_v30  ;;  %v993_v17 = vadd.f32 %v975_v29, %v943_v32 }
 0x1d1   : > { %1741 = vrsqrt.f32 %v999_v31 }
 0x1d2   : > { %v1001_v33 = vmax.f32 %v993_v17, 1e-24 }
 0x1d3   : > { %v978_v19 = vpop.xlane.xlu1 %977  ;;  %v946_v34 = vpop.xlane.xlu0 %945 }
 0x1d4   : > { %1743 = vrsqrt.f32 %v1001_v33  ;;  %v994_v21 = vadd.f32 %v978_v19, %v946_v34 }
 0x1d6   : > { %v1002_v23 = vmax.f32 %v994_v21, 1e-24 }
 0x1d7   : > { %v981_v36 = vpop.xlane.xlu1 %980  ;;  %v949_v37 = vpop.xlane.xlu0 %948 }
 0x1d8   : > { %1745 = vrsqrt.f32 %v1002_v23  ;;  %v995_v42 = vadd.f32 %v981_v36, %v949_v37 }
 0x1da   : > { %v1740_v44 = vpop.eup %1739  ;;  %v1003_v47 = vmax.f32 %v995_v42, 1e-24 }
 0x1db   : > { %v1742_v48 = vpop.eup %1741  ;;  %v984_v40 = vpop.xlane.xlu1 %983  ;;  %v1025_v50 = vmul.f32 %v1740_v44, %v2096_v25 }
 0x1dc   : > { %v952_v49 = vpop.xlane.xlu0 %951  ;;  %1747 = vrsqrt.f32 %v1003_v47  ;;  %v1024_v52 = vmul.f32 %v1742_v48, %v2098_v27  ;;  %v1015_v8 = vmul.f32 %v1742_v48, %v2060_v61 }
 0x1dd   : > { %v996_v43 = vadd.f32 %v984_v40, %v952_v49 }
 0x1de   : > { %v1744_v53 = vpop.eup %1743  ;;  %1599 = vmatprep.mubr.msk.f32.mxu0 %vm918_vm3, %v1024_v52 }
 0x1df   : > { %v1004_v54 = vmax.f32 %v996_v43, 1e-24  ;;  %1600 = vmatmul.mubr.msk.f32.vlgmr.msra.gmra.mrb[8].mxu0 %vm918_vm3, %v1025_v50  ;;  %v987_v56 = vpop.xlane.xlu1 %986  ;;  %v1026_v59 = vmul.f32 %v1744_v53, %v2100_v35 }
 0x1e0   : > { %v955_v58 = vpop.xlane.xlu0 %954  ;;  %1612 = vmatpush3.msk.msra.mxu0 %vm1057_vm4, %v1023_v10 }
 0x1e1   : > { %1749 = vrsqrt.f32 %v1004_v54  ;;  %v997_v60 = vadd.f32 %v987_v56, %v955_v58  ;;  %1602 = vmatprep.mubr.msk.f32.mxu0 %vm918_vm3, %v1026_v59 }
 0x1e2   : > { %v1746_v25 = vpop.eup %1745 }
 0x1e3   : > { %v1005_v62 = vmax.f32 %v997_v60, 1e-24  ;;  %v990_v24 = vpop.xlane.xlu1 %989  ;;  %v1027_v51 = vmul.f32 %v1746_v25, %v2109_v38 }
 0x1e4   : > { %v958_v27 = vpop.xlane.xlu0 %957 }
 0x1e5   : > { %1751 = vrsqrt.f32 %v1005_v62  ;;  %v998_v63 = vadd.f32 %v990_v24, %v958_v27  ;;  %1603 = vmatmul.mubr.msk.f32.gmra.mrb[10].mxu0 %vm918_vm3, %v1027_v51 }
 0x1e6   : > { %v1748_v0 = vpop.eup %1747 }
 0x1e7   : > { %v1006_v2 = vmax.f32 %v998_v63, 1e-24  ;;  %v1028_v35 = vmul.f32 %v1748_v0, %v2111_v39  ;;  %v1016_v39 = vmul.f32 %v1740_v44, %v2058_v57  ;;  %v1019_v61 = vmul.f32 %v1748_v0, %v2072_v18 }
 0x1e9   : > { %1753 = vrsqrt.f32 %v1006_v2  ;;  %1605 = vmatprep.mubr.msk.f32.mxu0 %vm918_vm3, %v1028_v35 }
 0x1eb   : > { %v1750_v26 = vpop.eup %1749 }
 0x1ec   : > { %v1029_v3 = vmul.f32 %v1750_v26, %v2113_v41  ;;  %v1017_v41 = vmul.f32 %v1744_v53, %v2066_v11  ;;  %v1020_v57 = vmul.f32 %v1750_v26, %v2069_v16 }
 0x1ee   : > { %1606 = vmatmul.mubr.msk.f32.gmra.mrb[12].mxu0 %vm918_vm3, %v1029_v3 }
 0x1ef   : > { %v1752_v55 = vpop.eup %1751 }
 0x1f0   : > { %v1030_v4 = vmul.f32 %v1752_v55, %v2120_v45  ;;  %v1018_v45 = vmul.f32 %v1746_v25, %v2063_v7  ;;  %v1021_v11 = vmul.f32 %v1752_v55, %v2078_v22 }
 0x1f2   : > { %1608 = vmatprep.mubr.msk.f32.mxu0 %vm918_vm3, %v1030_v4 }
 0x1f3   : > { %v1754_v38 = vpop.eup %1753 }
 0x1f4   : > { %v1031_v6 = vmul.f32 %v1754_v38, %v2122_v46  ;;  %v1022_v46 = vmul.f32 %v1754_v38, %v2075_v20 }
 0x1f6   : > { %1609 = vmatmul.mubr.msk.f32.gmra.mrb[14].mxu0 %vm918_vm3, %v1031_v6 }
 0x1f7   : > { %1613 = vmatprep.mubr.msk.f32.mxu0 %vm918_vm3, %v1015_v8 }
 0x1fa   : > { %1614 = vmatmul.mubr.msk.f32.vlgmr.msra.gmra.mrb[8].mxu0 %vm918_vm3, %v1016_v39 }
 0x1fb   : > { %1616 = vmatprep.mubr.msk.f32.mxu0 %vm918_vm3, %v1017_v41 }
 0x1fe   : > { %1617 = vmatmul.mubr.msk.f32.gmra.mrb[10].mxu0 %vm918_vm3, %v1018_v45 }
 0x1ff   : > { %1619 = vmatprep.mubr.msk.f32.mxu0 %vm918_vm3, %v1019_v61 }
 0x202   : > { %1620 = vmatmul.mubr.msk.f32.gmra.mrb[12].mxu0 %vm918_vm3, %v1020_v57 }
 0x203   : > { %1622 = vmatprep.mubr.msk.f32.mxu0 %vm918_vm3, %v1021_v11 }
 0x206   : > { %1623 = vmatmul.mubr.msk.f32.gmra.mrb[14].mxu0 %vm918_vm3, %v1022_v46 }
 0x2cd   : > { %v1615_v7 = vpop.f32.mrb[8].mxu0 }
 0x2ce   : > { %1299 = vst [vmem:[%s2089_s1 + $0x8] sm:$0xff] %v1615_v7  ;;  %v1259_v18 = vpop.f32.mrb[9].mxu0 }
 0x2cf   : > { %1298 = vst [vmem:[%s2089_s1] sm:$0xff] %v1259_v18 }
 0x2d1   : > { %v1618_v16 = vpop.f32.mrb[10].mxu0 }
 0x2d2   : > { %1301 = vst [vmem:[%s2089_s1 + $0x18] sm:$0xff] %v1618_v16  ;;  %v1269_v22 = vpop.f32.mrb[11].mxu0 }
 0x2d3   : > { %1300 = vst [vmem:[%s2089_s1 + $0x10] sm:$0xff] %v1269_v22 }
 0x2d5   : > { %v1621_v20 = vpop.f32.mrb[12].mxu0 }
 0x2d6   : > { %1303 = vst [vmem:[%s2089_s1 + $0x28] sm:$0xff] %v1621_v20  ;;  %v1279_v9 = vpop.f32.mrb[13].mxu0 }
 0x2d7   : > { %1302 = vst [vmem:[%s2089_s1 + $0x20] sm:$0xff] %v1279_v9 }
 0x2d9   : > { %v1624_v1 = vpop.f32.mrb[14].mxu0 }
 0x2da   : > { %1305 = vst [vmem:[%s2089_s1 + $0x38] sm:$0xff] %v1624_v1  ;;  %v1289_v10 = vpop.f32.mrb[15].mxu0 }
 0x2db   : > { %1304 = vst [vmem:[%s2089_s1 + $0x30] sm:$0xff] %v1289_v10 }
 0x2dc   : > { %1768 = shalt.err (!%p1765_p9)
}
 0x2dd   : > { %s1769_s1 = scalar_lea.hbm %s2218_s27, 1024  ;;  %s1773_s9 = scalar_lea.hbm %s2285_s7, 8192 }
 0x2de   : > { %p1770_p10 = scmp.ne.s32.totalorder %s2218_s27, %s1769_s1  ;;  %p1774_p13 = scmp.lt.u32.totalorder %s2218_s27, %s2285_s7 }
 0x2df   : > { %p1775_p0 = scmp.lt.u32.totalorder %s1773_s9, %s1769_s1  ;;  %p1777_p2 = scmp.lt.u32.totalorder %s1769_s1, %s2218_s27 }
 0x2e0   : > { %p1771_p11 = pnand %p1770_p10, %p1946_p3 }
 0x2e1   : > { %p1776_p1 = por %p1775_p0, %p1774_p13 }
 0x2e2   : > { %p1772_p12 = pneg %p1771_p11 }
 0x2e3   : > { %p1778_p4 = por %p1777_p2, %p1776_p1 }
 0x2e5   : > { %p1779_p5 = pnand %p1778_p4, %p1772_p12 }
 0x2e7   : > { %1782 = shalt.err (!%p1779_p5)
}
 0x2e8   : > { %s1853_s28 = smov 128   ;;  %s1854_s20 = smov 8  }
 0x2e9   : > { %1633 = dma.vmem_to_hbm [thread:$0]  (%p1946_p3), %s2220_s10, 1024, %s2218_s27, %s2226_s2, %s1853_s28, %s1853_s28, %s1854_s20  }
 0x2ea PF: > { %p1639_p6 = scmp.ge.s32.totalorder %s1849_s8, 2  ;;  %s1339_s23 = sand.u32 1, %s1821_s24  }
 0x2eb   : > { %s1340_s17 = scalar_lea.sflag [#allocation4], %s1339_s23 }
 0x2ec   : > { %p1636_p7 = pnand %p1639_p6, %p1955_p8 }
 0x2ee   : > { %1816 = dma.done.wait (!%p1636_p7), %s1340_s17, 1024  }
 0x2ef   : > { %1818 = vsyncadd (!%p1636_p7), %s1340_s17, 4294966272  ;;  %s20_s8 = sadd.s32 1, %s1849_s8   ;;  %s2294_s24 = smov %s1825_s25 }
 0x2f0   : > { %p17_p9 = scmp.ge.s32.totalorder %s20_s8, 10   ;;  %s2295_s25 = smov %s1829_s26 }
 0x2f1   : > { %s2296_s26 = smov %s1964_s19  ;;  %s2297_s27 = smov %s1841_s29 }
 0x2f2   : > { %s2298_s28 = smov %s1845_s30  ;;  %s2299_s29 = smov %s2302_s11 }
 0x2f3   : > { %s2300_s30 = smov %s2306_s12  ;;  %19 = sbr.rel (!%p17_p9) target bundleno = 8 (0x8), region = 87 }
 0x2fa   :  { %1345 = vsyncpa [#allocation4], 1 }
 0x2fb   :  { %1347 = vsyncpa [#allocation4 + $0x1], 1 }

</bundles_post_ra>
